<compile_context>
chip_gen: v5e
topology: v5e:2x2
jax: 0.10.0
libtpu: 0.0.40
codegen_flags: <defaults>
</compile_context>

<pallas_src>
import jax
import jax.numpy as jnp
from jax.experimental import pallas as pl
from jax.experimental.pallas import tpu as pltpu

BN_EPS = 1e-5
ALPHA = 1.0


# ---------------------------------------------------------------------------
# Kernel: (tile_b, d_in) x -> (tile_b, 128) output (column 0 is the real output)
# ---------------------------------------------------------------------------
def lora_net_kernel(x_ref, w1_ref, b1_ref, w2_ref, b2_ref, w3_ref, o_ref):
    x = x_ref[...]
    # fc1 (+ folded LoRA + folded BN) + ReLU
    h = jnp.dot(x, w1_ref[...], preferred_element_type=jnp.float32) + b1_ref[...]
    h = jnp.maximum(h, 0.0)
    # dropout -> identity (eval mode)
    # fc2 (+ folded LoRA + folded BN) + ReLU
    h = jnp.dot(h, w2_ref[...], preferred_element_type=jnp.float32) + b2_ref[...]
    h = jnp.maximum(h, 0.0)
    # dropout -> identity (eval mode)
    # fc3 (+ folded LoRA)
    o_ref[...] = jnp.dot(h, w3_ref[...], preferred_element_type=jnp.float32)


# ---------------------------------------------------------------------------
# Wrapper: algebraic folding + lane padding + batch-tiled pallas_call
# ---------------------------------------------------------------------------
def _round_up(n, m):
    return ((n + m - 1) // m) * m


def _pad_to(arr, shape):
    pads = [(0, t - s) for s, t in zip(arr.shape, shape)]
    return jnp.pad(arr, pads)


def lora_net_forward(x, params, tile_b=None):
    """x: [B, input_size] float32.  params: flat tuple of weight arrays."""
    B, d_in = x.shape
    (w1, a1, lb1, g1, be1, m1, v1,
     w2, a2, lb2, g2, be2, m2, v2,
     w3, a3, lb3) = params

    # --- fold LoRA delta into the base weight (weights already [in, out]) ---
    W1 = w1 + ALPHA * (a1 @ lb1)              # [d_in, 64]
    W2 = w2 + ALPHA * (a2 @ lb2)              # [64, 32]
    W3 = w3 + ALPHA * (a3 @ lb3)              # [32, 1]

    # --- fold eval-mode BatchNorm into the preceding linear ---
    s1 = g1 * jax.lax.rsqrt(v1 + BN_EPS)      # [1, 64]
    s2 = g2 * jax.lax.rsqrt(v2 + BN_EPS)      # [1, 32]
    W1 = W1 * s1
    bias1 = be1 - m1 * s1                     # [1, 64]
    W2 = W2 * s2
    bias2 = be2 - m2 * s2                     # [1, 32]

    # --- zero-pad feature dims to 128 lanes (lane-dense MXU inputs & stores) ---
    H1P = 128   # hidden 64  -> 128
    H2P = 128   # hidden 32  -> 128
    OUTP = 128  # out 1      -> 128 (slice column 0 afterwards)
    W1p = _pad_to(W1, (d_in, H1P))
    b1p = _pad_to(bias1, (1, H1P))            # padded cols: bias 0 -> relu(0)=0
    W2p = _pad_to(W2, (H1P, H2P))             # padded rows are zero -> no contribution
    b2p = _pad_to(bias2, (1, H2P))
    W3p = _pad_to(W3, (H2P, OUTP))

    # --- batch tiling (double-buffered BlockSpec pipeline over the batch axis) ---
    if tile_b is None:
        # big tiles for HBM-roofline; small batches get a single aligned tile.
        tile_b = min(512, _round_up(B, 8))
    Bp = _round_up(B, tile_b)
    xp = jnp.pad(x, ((0, Bp - B), (0, 0)))
    grid = (Bp // tile_b,)

    out = pl.pallas_call(
        lora_net_kernel,
        out_shape=jax.ShapeDtypeStruct((Bp, OUTP), jnp.float32),
        grid=grid,
        in_specs=[
            pl.BlockSpec((tile_b, d_in), lambda i: (i, 0)),   # activations: tiled
            pl.BlockSpec((d_in, H1P), lambda i: (0, 0)),      # weights/bias: resident
            pl.BlockSpec((1, H1P), lambda i: (0, 0)),
            pl.BlockSpec((H1P, H2P), lambda i: (0, 0)),
            pl.BlockSpec((1, H2P), lambda i: (0, 0)),
            pl.BlockSpec((H2P, OUTP), lambda i: (0, 0)),
        ],
        out_specs=pl.BlockSpec((tile_b, OUTP), lambda i: (i, 0)),
        compiler_params=pltpu.CompilerParams(
            dimension_semantics=("parallel",)),
    )(xp, W1p, b1p, W2p, b2p, W3p)

    return out[:B, :1]


# ---------------------------------------------------------------------------
# Parameter init (PyTorch-shaped) and pure-JAX reference (unfolded semantics)
# ---------------------------------------------------------------------------
def init_params(key, input_size, rank):
    """Deterministic parameter init matching the PyTorch module's shapes."""
    dims = [(input_size, 64), (64, 32), (32, 1)]
    params = []
    keys = jax.random.split(key, 32)
    ki = 0

    def nxt():
        nonlocal ki
        k = keys[ki]
        ki += 1
        return k

    for li, (din, dout) in enumerate(dims):
        # base linear weight: PyTorch stores [out, in]; pre-transpose to [in, out]
        w = (jax.random.normal(nxt(), (dout, din), jnp.float32)
             * (1.0 / jnp.sqrt(din))).T
        a = jax.random.normal(nxt(), (din, rank), jnp.float32) * 1e-8
        b = jax.random.normal(nxt(), (rank, dout), jnp.float32) * 1e-8
        params += [w, a, b]
        if li < 2:  # bn1, bn2 (no BN after fc3)
            gamma = 1.0 + 0.1 * jax.random.normal(nxt(), (1, dout), jnp.float32)
            beta = 0.1 * jax.random.normal(nxt(), (1, dout), jnp.float32)
            rmean = 0.1 * jax.random.normal(nxt(), (1, dout), jnp.float32)
            rvar = 1.0 + 0.1 * jax.random.uniform(nxt(), (1, dout), jnp.float32)
            params += [gamma, beta, rmean, rvar]
    return tuple(params)


def reference_forward(x, params):
    """Pure-JAX reference (un-folded, matches the PyTorch module's algebra)."""
    (w1, a1, b1, g1, be1, m1, v1,
     w2, a2, b2, g2, be2, m2, v2,
     w3, a3, b3) = params

    def lora(h, w, a, b):
        return h @ w + ALPHA * ((h @ a) @ b)

    def bn_relu(h, g, be, m, v):
        return jnp.maximum((h - m) / jnp.sqrt(v + BN_EPS) * g + be, 0.0)

    h = bn_relu(lora(x, w1, a1, b1), g1, be1, m1, v1)
    h = bn_relu(lora(h, w2, a2, b2), g2, be2, m2, v2)
    return lora(h, w3, a3, b3)


if __name__ == "__main__":
    INPUT_SIZE = 32
    RANK = 4
    BATCH = 8

    key = jax.random.PRNGKey(0)
    kx, kp = jax.random.split(key)
    x = jax.random.normal(kx, (BATCH, INPUT_SIZE), jnp.float32)
    params = init_params(kp, INPUT_SIZE, RANK)

    out = lora_net_forward(x, params)
    out = jax.block_until_ready(out)

    ref = reference_forward(x, params)
    assert out.shape == (BATCH, 1), out.shape
    assert jnp.allclose(out, ref, atol=1e-4, rtol=1e-4), \
        f"max abs err = {jnp.max(jnp.abs(out - ref))}"

    print("KERNEL_OK")
</pallas_src>

<mosaic_0001>
module attributes {stable_mosaic.version = 11 : i64} {
  func.func @lora_net_kernel(%arg0: i32, %arg1: memref<8x32xf32, #tpu.memory_space<vmem>>, %arg2: memref<32x128xf32, #tpu.memory_space<vmem>>, %arg3: memref<1x128xf32, #tpu.memory_space<vmem>>, %arg4: memref<128x128xf32, #tpu.memory_space<vmem>>, %arg5: memref<1x128xf32, #tpu.memory_space<vmem>>, %arg6: memref<128x128xf32, #tpu.memory_space<vmem>>, %arg7: memref<8x128xf32, #tpu.memory_space<vmem>>) attributes {dimension_semantics = [#tpu.dimension_semantics<parallel>], iteration_bounds = array<i64: 1>, scalar_prefetch = 0 : i64, scratch_operands = 0 : i64, tpu.core_type = #tpu.core_type<tc>, window_params = [{transform_indices = @transform_0, window_bounds = array<i64: 8, 32>}, {pipeline_mode = #tpu.pipeline_mode<synchronous>, transform_indices = @transform_1, window_bounds = array<i64: 32, 128>}, {pipeline_mode = #tpu.pipeline_mode<synchronous>, transform_indices = @transform_2, window_bounds = array<i64: 1, 128>}, {pipeline_mode = #tpu.pipeline_mode<synchronous>, transform_indices = @transform_3, window_bounds = array<i64: 128, 128>}, {pipeline_mode = #tpu.pipeline_mode<synchronous>, transform_indices = @transform_4, window_bounds = array<i64: 1, 128>}, {pipeline_mode = #tpu.pipeline_mode<synchronous>, transform_indices = @transform_5, window_bounds = array<i64: 128, 128>}, {transform_indices = @transform_6, window_bounds = array<i64: 8, 128>}]} {
    %c0 = arith.constant 0 : index
    %c0_0 = arith.constant 0 : index
    %0 = vector.load %arg1[%c0, %c0_0] : memref<8x32xf32, #tpu.memory_space<vmem>>, vector<8x32xf32>
    %c0_1 = arith.constant 0 : index
    %c0_2 = arith.constant 0 : index
    %1 = vector.load %arg2[%c0_1, %c0_2] : memref<32x128xf32, #tpu.memory_space<vmem>>, vector<32x128xf32>
    %cst = arith.constant dense<0.000000e+00> : vector<8x128xf32>
    %2 = tpu.matmul %0, %1, %cst {dimension_numbers = #tpu.dot_dimension_numbers<[1], [0], [0], [1], [0, 0, 1, 1], [], []>} : vector<8x32xf32>, vector<32x128xf32>, vector<8x128xf32> -> vector<8x128xf32>
    %c0_3 = arith.constant 0 : index
    %c0_4 = arith.constant 0 : index
    %3 = vector.load %arg3[%c0_3, %c0_4] : memref<1x128xf32, #tpu.memory_space<vmem>>, vector<1x128xf32>
    %4 = vector.broadcast %3 : vector<1x128xf32> to vector<8x128xf32>
    %5 = arith.addf %2, %4 : vector<8x128xf32>
    %cst_5 = arith.constant 0.000000e+00 : f32
    %6 = vector.broadcast %cst_5 : f32 to vector<8x128xf32>
    %7 = arith.maximumf %5, %6 : vector<8x128xf32>
    %c0_6 = arith.constant 0 : index
    %c0_7 = arith.constant 0 : index
    %8 = vector.load %arg4[%c0_6, %c0_7] : memref<128x128xf32, #tpu.memory_space<vmem>>, vector<128x128xf32>
    %cst_8 = arith.constant dense<0.000000e+00> : vector<8x128xf32>
    %9 = tpu.matmul %7, %8, %cst_8 {dimension_numbers = #tpu.dot_dimension_numbers<[1], [0], [0], [1], [0, 0, 1, 1], [], []>} : vector<8x128xf32>, vector<128x128xf32>, vector<8x128xf32> -> vector<8x128xf32>
    %c0_9 = arith.constant 0 : index
    %c0_10 = arith.constant 0 : index
    %10 = vector.load %arg5[%c0_9, %c0_10] : memref<1x128xf32, #tpu.memory_space<vmem>>, vector<1x128xf32>
    %11 = vector.broadcast %10 : vector<1x128xf32> to vector<8x128xf32>
    %12 = arith.addf %9, %11 : vector<8x128xf32>
    %cst_11 = arith.constant 0.000000e+00 : f32
    %13 = vector.broadcast %cst_11 : f32 to vector<8x128xf32>
    %14 = arith.maximumf %12, %13 : vector<8x128xf32>
    %c0_12 = arith.constant 0 : index
    %c0_13 = arith.constant 0 : index
    %15 = vector.load %arg6[%c0_12, %c0_13] : memref<128x128xf32, #tpu.memory_space<vmem>>, vector<128x128xf32>
    %cst_14 = arith.constant dense<0.000000e+00> : vector<8x128xf32>
    %16 = tpu.matmul %14, %15, %cst_14 {dimension_numbers = #tpu.dot_dimension_numbers<[1], [0], [0], [1], [0, 0, 1, 1], [], []>} : vector<8x128xf32>, vector<128x128xf32>, vector<8x128xf32> -> vector<8x128xf32>
    %c0_15 = arith.constant 0 : index
    %c0_16 = arith.constant 0 : index
    %17 = vector.load %arg7[%c0_15, %c0_16] : memref<8x128xf32, #tpu.memory_space<vmem>>, vector<8x128xf32>
    tpu.vector_store %arg7[%c0_15, %c0_16], %16 {strides = array<i32>} : memref<8x128xf32, #tpu.memory_space<vmem>>, vector<8x128xf32>,
    return
  }
  func.func @transform_0(%arg0: i32) -> (i32, i32) {
    %c0_i32 = arith.constant 0 : i32
    %c0_i32_0 = arith.constant 0 : i32
    return %arg0, %c0_i32 : i32, i32
  }
  func.func @transform_1(%arg0: i32) -> (i32, i32) {
    %c0_i32 = arith.constant 0 : i32
    %c0_i32_0 = arith.constant 0 : i32
    %c0_i32_1 = arith.constant 0 : i32
    return %c0_i32, %c0_i32_0 : i32, i32
  }
  func.func @transform_2(%arg0: i32) -> (i32, i32) {
    %c0_i32 = arith.constant 0 : i32
    %c0_i32_0 = arith.constant 0 : i32
    %c0_i32_1 = arith.constant 0 : i32
    return %c0_i32, %c0_i32_0 : i32, i32
  }
  func.func @transform_3(%arg0: i32) -> (i32, i32) {
    %c0_i32 = arith.constant 0 : i32
    %c0_i32_0 = arith.constant 0 : i32
    %c0_i32_1 = arith.constant 0 : i32
    return %c0_i32, %c0_i32_0 : i32, i32
  }
  func.func @transform_4(%arg0: i32) -> (i32, i32) {
    %c0_i32 = arith.constant 0 : i32
    %c0_i32_0 = arith.constant 0 : i32
    %c0_i32_1 = arith.constant 0 : i32
    return %c0_i32, %c0_i32_0 : i32, i32
  }
  func.func @transform_5(%arg0: i32) -> (i32, i32) {
    %c0_i32 = arith.constant 0 : i32
    %c0_i32_0 = arith.constant 0 : i32
    %c0_i32_1 = arith.constant 0 : i32
    return %c0_i32, %c0_i32_0 : i32, i32
  }
  func.func @transform_6(%arg0: i32) -> (i32, i32) {
    %c0_i32 = arith.constant 0 : i32
    %c0_i32_0 = arith.constant 0 : i32
    return %arg0, %c0_i32 : i32, i32
  }
}

</mosaic_0001>

<bundles_post_ra>
// kernel: tpu_custom_call.1
= control target key start
LH: loop header
LB: loop body
LE: loop exit
PB: predicated region body
PF: predicated region fallthrough
CT: control target
= control target key end

     0   :  { %11 = vsyncpa [#allocation3], 0  ;;  %s417_s0 = inlined_call_operand.hbm [shape: f32[8,32], index: 0, kind: input, shape index: {}]   ;;  %s418_s1 = inlined_call_operand.hbm [shape: f32[32,128], index: 1, kind: input, shape index: {}]   ;;  %s419_s2 = inlined_call_operand.vmem [shape: f32[1,128], index: 2, kind: input, shape index: {}]   ;;  %s420_s3 = inlined_call_operand.hbm [shape: f32[128,128], index: 3, kind: input, shape index: {}]   ;;  %s421_s4 = inlined_call_operand.vmem [shape: f32[1,128], index: 4, kind: input, shape index: {}]   ;;  %s422_s5 = inlined_call_operand.hbm [shape: f32[128,128], index: 5, kind: input, shape index: {}]   ;;  %s423_s6 = inlined_call_operand.hbm [shape: f32[8,128], index: 6, kind: output, shape index: {}]  }
   0x1   :  { %12 = vsyncpa [#allocation6], 0 }
   0x2   :  { %13 = vsyncpa [#allocation9], 0  ;;  %s30_s23 = sshll.u32 %s418_s1, 4  ;;  %s31_s23 = int_to_ptr.hbm [resolvable:$true] %s30_s23 }
   0x3   :  { %14 = vsyncpa [#allocation4], 0  ;;  %s354_s24 = smov [#allocation5]   ;;  %s20_s28 = sshll.u32 %s417_s0, 4  ;;  %s21_s28 = int_to_ptr.hbm [resolvable:$true] %s20_s28 }
   0x4   :  { %s32_s25 = sshll.u32 %s354_s24, 4  ;;  %s355_s29 = smov 128   ;;  %s33_s25 = int_to_ptr.vmem [resolvable:$true] %s32_s25 }
   0x5   :  { %s356_s30 = smov 8   ;;  %s357_s7 = smov [#allocation2]  }
   0x6   :  { %38 = dma.hbm_to_vmem [thread:$0]  %s31_s23, 512, %s33_s25, [#allocation6], %s355_s29, %s355_s29, %s356_s30  }
   0x7   :  { %s22_s8 = sshll.u32 %s357_s7, 4  ;;  %s45_s11 = sshll.u32 %s420_s3, 4  ;;  %s23_s8 = int_to_ptr.vmem [resolvable:$true] %s22_s8  ;;  %s46_s11 = int_to_ptr.hbm [resolvable:$true] %s45_s11 }
   0x8   :  { %25 = dma.hbm_to_vmem [thread:$0]  %s21_s28, 128, %s23_s8, [#allocation3]  }
   0x9   :  { %s60_s13 = sshll.u32 %s422_s5, 4  ;;  %s358_s14 = smov [#allocation7]   ;;  %s61_s13 = int_to_ptr.hbm [resolvable:$true] %s60_s13 }
   0xa   :  { %s47_s15 = sshll.u32 %s358_s14, 4  ;;  %s359_s0 = smov [#allocation8]   ;;  %s48_s15 = int_to_ptr.vmem [resolvable:$true] %s47_s15 }
   0xb   :  { %53 = dma.hbm_to_vmem [thread:$0]  %s46_s11, 2048, %s48_s15, [#allocation6], %s355_s29, %s355_s29, %s356_s30  }
   0xc   :  { %s62_s16 = sshll.u32 %s359_s0, 4  ;;  %s63_s16 = int_to_ptr.vmem [resolvable:$true] %s62_s16 }
   0xd   :  { %68 = dma.hbm_to_vmem [thread:$0]  %s61_s13, 2048, %s63_s16, [#allocation9], %s355_s29, %s355_s29, %s356_s30  }
   0xe   :  { %346 = dma.done.wait [#allocation3], 128  }
   0xf   :  { %347 = vsyncadd [#allocation3], 4294967168 }
  0x10   :  { %348 = dma.done.wait [#allocation6], 2560  }
  0x11   :  { %349 = vsyncadd [#allocation6], 4294964736 }
  0x12   :  { %350 = dma.done.wait [#allocation9], 2048  }
  0x13   :  { %351 = vsyncadd [#allocation9], 4294965248  ;;  %v89_v0 = vld [vmem:[#allocation5 + $0x18] sm:$0xff]  ;;  %v88_v1 = vld [vmem:[#allocation5 + $0x10] sm:$0xff]  ;;  %vm94_vm0 = vcmask 261120   ;;  %s204_s22 = sshll.u32 %s423_s6, 4  ;;  %s205_s22 = int_to_ptr.hbm [resolvable:$true] %s204_s22 }
  0x14   :  { %110 = vmatpush.msra.mxu0 %v89_v0  ;;  %v134_v2 = vld [vmem:[#allocation7 + $0x78] sm:$0xff]  ;;  %v87_v3 = vld [vmem:[#allocation5 + $0x8] sm:$0xff]  ;;  %v133_v4 = vld [vmem:[#allocation7 + $0x70] sm:$0xff] }
  0x15   :  { %139 = vmatpush.msra.mxu1 %v134_v2  ;;  %v132_v5 = vld [vmem:[#allocation7 + $0x68] sm:$0xff]  ;;  %v86_v6 = vld [vmem:[#allocation5] sm:$0xff]  ;;  %v85_v7 = vld [vmem:[#allocation2] sm:$0xff] }
  0x16   :  { %111 = vmatpush.msra.mxu0 %v88_v1  ;;  %v131_v8 = vld [vmem:[#allocation7 + $0x60] sm:$0xff]  ;;  %v130_v9 = vld [vmem:[#allocation7 + $0x58] sm:$0xff]  ;;  %v129_v10 = vld [vmem:[#allocation7 + $0x50] sm:$0xff] }
  0x17   :  { %140 = vmatpush.msra.mxu1 %v133_v4  ;;  %v128_v11 = vld [vmem:[#allocation7 + $0x48] sm:$0xff]  ;;  %v127_v12 = vld [vmem:[#allocation7 + $0x40] sm:$0xff]  ;;  %v126_v13 = vld [vmem:[#allocation7 + $0x38] sm:$0xff] }
  0x18   :  { %112 = vmatpush.msra.mxu0 %v87_v3  ;;  %v125_v14 = vld [vmem:[#allocation7 + $0x30] sm:$0xff]  ;;  %v124_v15 = vld [vmem:[#allocation7 + $0x28] sm:$0xff]  ;;  %v123_v16 = vld [vmem:[#allocation7 + $0x20] sm:$0xff] }
  0x19   :  { %141 = vmatpush.msra.mxu1 %v132_v5  ;;  %v122_v17 = vld [vmem:[#allocation7 + $0x18] sm:$0xff]  ;;  %v121_v18 = vld [vmem:[#allocation7 + $0x10] sm:$0xff]  ;;  %v120_v19 = vld [vmem:[#allocation7 + $0x8] sm:$0xff] }
  0x1a   :  { %113 = vmatpush.msra.mxu0 %v86_v6  ;;  %v119_v20 = vld [vmem:[#allocation7] sm:$0xff]  ;;  %v175_v21 = vld [vmem:[#allocation8 + $0x78] sm:$0xff]  ;;  %v174_v22 = vld [vmem:[#allocation8 + $0x70] sm:$0xff] }
  0x1b   :  { %216 = vmatmul.msk.f32.vlgmr.msra.gmra.mxu0 %vm94_vm0, %v85_v7  ;;  %142 = vmatpush.msra.mxu1 %v131_v8  ;;  %v173_v23 = vld [vmem:[#allocation8 + $0x68] sm:$0xff]  ;;  %v172_v24 = vld [vmem:[#allocation8 + $0x60] sm:$0xff]  ;;  %v171_v25 = vld [vmem:[#allocation8 + $0x58] sm:$0xff] }
  0x1c   :  { %176 = vmatpush.msra.mxu2 %v175_v21  ;;  %v170_v26 = vld [vmem:[#allocation8 + $0x50] sm:$0xff]  ;;  %v169_v27 = vld [vmem:[#allocation8 + $0x48] sm:$0xff]  ;;  %v168_v28 = vld [vmem:[#allocation8 + $0x40] sm:$0xff] }
  0x1d   :  { %143 = vmatpush.msra.mxu1 %v130_v9  ;;  %v167_v29 = vld [vmem:[#allocation8 + $0x38] sm:$0xff]  ;;  %v166_v30 = vld [vmem:[#allocation8 + $0x30] sm:$0xff]  ;;  %v165_v31 = vld [vmem:[#allocation8 + $0x28] sm:$0xff] }
  0x1e   :  { %177 = vmatpush.msra.mxu2 %v174_v22  ;;  %v164_v32 = vld [vmem:[#allocation8 + $0x20] sm:$0xff]  ;;  %v163_v33 = vld [vmem:[#allocation8 + $0x18] sm:$0xff]  ;;  %v162_v38 = vld [vmem:[#allocation8 + $0x10] sm:$0xff] }
  0x1f   :  { %144 = vmatpush.msra.mxu1 %v129_v10  ;;  %v224_v34 = vld [vmem:[%s419_s2] ss:$0 sm:$0xff]  ;;  %v161_v39 = vld [vmem:[#allocation8 + $0x8] sm:$0xff]  ;;  %v160_v40 = vld [vmem:[#allocation8] sm:$0xff]  ;;  %s360_s2 = smov [#allocation10]  }
  0x20   :  { %178 = vmatpush.msra.mxu2 %v173_v23  ;;  %v225_v41 = vld [vmem:[%s421_s4] ss:$0 sm:$0xff]  ;;  %s202_s19 = sshll.u32 %s360_s2, 4  ;;  %s203_s19 = int_to_ptr.vmem [resolvable:$true] %s202_s19 }
  0x21   :  { %145 = vmatpush.msra.mxu1 %v128_v11 }
  0x22   :  { %179 = vmatpush.msra.mxu2 %v172_v24 }
  0x23   :  { %146 = vmatpush.msra.mxu1 %v127_v12 }
  0x24   :  { %180 = vmatpush.msra.mxu2 %v171_v25 }
  0x25   :  { %147 = vmatpush.msra.mxu1 %v126_v13 }
  0x26   :  { %181 = vmatpush.msra.mxu2 %v170_v26 }
  0x27   :  { %148 = vmatpush.msra.mxu1 %v125_v14 }
  0x28   :  { %182 = vmatpush.msra.mxu2 %v169_v27 }
  0x29   :  { %149 = vmatpush.msra.mxu1 %v124_v15 }
  0x2a   :  { %183 = vmatpush.msra.mxu2 %v168_v28 }
  0x2b   :  { %150 = vmatpush.msra.mxu1 %v123_v16 }
  0x2c   :  { %184 = vmatpush.msra.mxu2 %v167_v29 }
  0x2d   :  { %151 = vmatpush.msra.mxu1 %v122_v17 }
  0x2e   :  { %185 = vmatpush.msra.mxu2 %v166_v30 }
  0x2f   :  { %152 = vmatpush.msra.mxu1 %v121_v18 }
  0x30   :  { %186 = vmatpush.msra.mxu2 %v165_v31 }
  0x31   :  { %153 = vmatpush.msra.mxu1 %v120_v19 }
  0x32   :  { %187 = vmatpush.msra.mxu2 %v164_v32 }
  0x33   :  { %154 = vmatpush.msra.mxu1 %v119_v20 }
  0x34   :  { %188 = vmatpush.msra.mxu2 %v163_v33 }
  0x36   :  { %189 = vmatpush.msra.mxu2 %v162_v38 }
  0x38   :  { %190 = vmatpush.msra.mxu2 %v161_v39 }
  0x3a   :  { %191 = vmatpush.msra.mxu2 %v160_v40 }
  0x98   :  { %v115_v35 = vpop.f32.mrf.mxu0 }
  0x99   :  { %v116_v36 = vadd.f32 %v224_v34, %v115_v35 }
  0x9b   :  { %v118_v37 = vmax.f32 %v116_v36, 0.0 }
  0x9d   :  { %155 = vmatmul.f32.vlgmr.msra.gmra.mxu1 %v118_v37 }
 0x11a   :  { %v156_v42 = vpop.f32.mrf.mxu1 }
 0x11b   :  { %v157_v43 = vadd.f32 %v225_v41, %v156_v42 }
 0x11d   :  { %v159_v44 = vmax.f32 %v157_v43, 0.0 }
 0x11f   :  { %192 = vmatmul.f32.vlgmr.msra.gmra.mxu2 %v159_v44 }
 0x1a2   :  { %v193_v45 = vpop.f32.mrf.mxu2 }
 0x1a3   :  { %196 = vst [vmem:[#allocation10] sm:$0xff] %v193_v45 }
 0x1a4   :  { %207 = dma.vmem_to_hbm [thread:$0]  %s203_s19, 128, %s205_s22, [#allocation4]  }
 0x1a5   :  { %352 = dma.done.wait [#allocation4], 128  }
 0x1a6   :  { %353 = vsyncadd [#allocation4], 4294967168 }
 0x1a7   :  { %212 = vsyncpa [#allocation3], 1 }
 0x1a8   :  { %213 = vsyncpa [#allocation6], 1 }
 0x1a9   :  { %214 = vsyncpa [#allocation9], 1 }
 0x1aa   :  { %215 = vsyncpa [#allocation4], 1 }

</bundles_post_ra>
